<compile_context>
chip_gen: v7x
topology: tpu7x:2x2x1
jax: 0.10.0
libtpu: 0.0.40
codegen_flags: <defaults>
</compile_context>

<pallas_src>
import jax
import jax.numpy as jnp
from jax import lax
from jax.experimental import pallas as pl
from jax.experimental.pallas import tpu as pltpu

_SUB = 8      # f32 sublane tile height
_LANE = 128   # lane width


def _round_up(x, m):
    return ((x + m - 1) // m) * m


def _make_mse_kernel(rows, tb):
    """Kernel accumulating per-lane partial sums of (real - pred)^2.

    `rows` is the number of valid rows in the (rows, 128) input slab; the last
    grid tile may extend past it (ragged), so that tile masks invalid rows.
    """

    def kernel(pred_ref, real_ref, out_ref):
        i = pl.program_id(0)
        last = pl.num_programs(0) - 1

        @pl.when(i == 0)
        def _init():
            out_ref[...] = jnp.zeros_like(out_ref)

        # In-kernel upcast: inputs travel HBM->VMEM in their native dtype.
        d = real_ref[...].astype(jnp.float32) - pred_ref[...].astype(jnp.float32)
        sq = d * d  # (tb, 128), VPU

        @pl.when(i != last)
        def _full_tile():
            # Fold sublane groups into one (8, 128) vreg-shaped partial:
            # pure vreg adds, no cross-lane work in the hot loop.
            out_ref[...] += sq.reshape(-1, _SUB, _LANE).sum(axis=0)

        @pl.when(i == last)
        def _ragged_tile():
            # Out-of-bounds rows of the last block hold unspecified data; zero
            # them before folding.  Cold path: runs once per call.
            row = lax.broadcasted_iota(jnp.int32, (tb, _LANE), 0) + i * tb
            masked = jnp.where(row < rows, sq, jnp.float32(0.0))
            out_ref[...] += masked.reshape(-1, _SUB, _LANE).sum(axis=0)

    return kernel


def mse_loss(pred, real, *, tile_rows=4096, min_kernel_elems=1 << 18):
    """Pallas equivalent of MSE.forward: sum((real - pred)**2) / numel."""
    assert pred.shape == real.shape, (pred.shape, real.shape)
    n = int(pred.size)

    # Tiny tensors: kernel launch / grid fixed costs dominate -- use fused XLA.
    if n < max(min_kernel_elems, _SUB * _LANE):
        d = real.astype(jnp.float32) - pred.astype(jnp.float32)
        return jnp.sum(d * d) / jnp.float32(n)

    pflat = pred.reshape(-1)   # zero-copy view of contiguous data
    rflat = real.reshape(-1)

    rem = n % _LANE
    if rem:
        # Rare path (numel not lane-aligned): append < 128 zeros, which
        # contribute 0 to the sum; the division below uses the true n.
        pad = _LANE - rem
        pflat = jnp.pad(pflat, (0, pad))
        rflat = jnp.pad(rflat, (0, pad))
    rows = int(pflat.size) // _LANE  # == cdiv(n, 128)

    # Dtype-aware tiling: sub-32-bit dtypes pack along sublanes, so round the
    # block height to 16 (bf16) / 32 (8-bit) and carry proportionally more
    # rows per tile to keep the same bytes-per-step.
    it_p = jnp.dtype(pred.dtype).itemsize
    it_r = jnp.dtype(real.dtype).itemsize
    sub = {4: _SUB, 2: 2 * _SUB, 1: 4 * _SUB}.get(min(it_p, it_r), _SUB)
    eff_tile_rows = tile_rows * max(1, 4 // max(it_p, it_r))
    tb = min(_round_up(eff_tile_rows, sub), _round_up(rows, sub))
    num_tiles = pl.cdiv(rows, tb)

    p2 = pflat.reshape(rows, _LANE)
    r2 = rflat.reshape(rows, _LANE)

    cost = pl.CostEstimate(
        flops=3 * n,
        transcendentals=0,
        bytes_accessed=n * (it_p + it_r) + _SUB * _LANE * 4,
    )

    partials = pl.pallas_call(
        _make_mse_kernel(rows, tb),
        out_shape=jax.ShapeDtypeStruct((_SUB, _LANE), jnp.float32),
        grid_spec=pltpu.PrefetchScalarGridSpec(
            num_scalar_prefetch=0,
            grid=(num_tiles,),
            in_specs=[
                pl.BlockSpec((tb, _LANE), lambda i: (i, 0)),
                pl.BlockSpec((tb, _LANE), lambda i: (i, 0)),
            ],
            out_specs=pl.BlockSpec((_SUB, _LANE), lambda i: (0, 0)),
        ),
        compiler_params=pltpu.CompilerParams(
            dimension_semantics=("arbitrary",),
        ),
        cost_estimate=cost,
    )(p2, r2)

    # Single cross-lane reduce + exactly one division by the true element count.
    return jnp.sum(partials) / jnp.float32(n)


def _ref_mse(pred, real):
    d = real.astype(jnp.float32) - pred.astype(jnp.float32)
    return jnp.sum(d * d) / jnp.float32(d.size)


if __name__ == "__main__":
    key = jax.random.PRNGKey(0)

    # (shape, dtype, kwargs) -- exercises: lane-aligned single tile, multi-tile
    # with ragged last tile, numel not a multiple of 128, bf16 inputs, and the
    # small-n jnp fallback (default kwargs).
    cases = [
        ((2, 4, 16, 16), jnp.float32, dict(min_kernel_elems=0)),
        ((2, 4, 16, 17), jnp.float32, dict(min_kernel_elems=0, tile_rows=8)),
        ((3, 5, 7, 11), jnp.float32, dict(min_kernel_elems=0)),
        ((2, 4, 16, 16), jnp.bfloat16, dict(min_kernel_elems=0)),
        ((2, 4, 16, 16), jnp.float32, {}),
    ]

    for idx, (shape, dtype, kwargs) in enumerate(cases):
        k1, k2 = jax.random.split(jax.random.fold_in(key, idx))
        pred = jax.random.normal(k1, shape, dtype=jnp.float32).astype(dtype)
        real = jax.random.normal(k2, shape, dtype=jnp.float32).astype(dtype)

        loss = mse_loss(pred, real, **kwargs)
        jax.block_until_ready(loss)

        ref = _ref_mse(pred, real)
        assert jnp.allclose(loss, ref, rtol=1e-5, atol=1e-5), (shape, loss, ref)

    print("KERNEL_OK")
</pallas_src>

<mosaic_0001>
module attributes {stable_mosaic.version = 11 : i64} {
  func.func @kernel(%arg0: i32, %arg1: memref<16x128xf32, #tpu.memory_space<vmem>>, %arg2: memref<16x128xf32, #tpu.memory_space<vmem>>, %arg3: memref<8x128xf32, #tpu.memory_space<vmem>>) attributes {dimension_semantics = [#tpu.dimension_semantics<arbitrary>], iteration_bounds = array<i64: 1>, scalar_prefetch = 0 : i64, scratch_operands = 0 : i64, tpu.core_type = #tpu.core_type<tc>, window_params = [{transform_indices = @transform_0, window_bounds = array<i64: 16, 128>}, {transform_indices = @transform_1, window_bounds = array<i64: 16, 128>}, {pipeline_mode = #tpu.pipeline_mode<synchronous>, transform_indices = @transform_2, window_bounds = array<i64: 8, 128>}]} {
    %c0_i32 = arith.constant 0 : i32
    %0 = arith.cmpi eq, %arg0, %c0_i32 : i32
    %1 = arith.extui %0 : i1 to i32
    %c0_i32_0 = arith.constant 0 : i32
    %2 = arith.cmpi ne, %1, %c0_i32_0 : i32
    scf.if %2 {
      %cst = arith.constant 0.000000e+00 : f32
      %13 = vector.broadcast %cst : f32 to vector<8x128xf32>
      %c0_8 = arith.constant 0 : index
      %c0_9 = arith.constant 0 : index
      %14 = vector.load %arg3[%c0_8, %c0_9] : memref<8x128xf32, #tpu.memory_space<vmem>>, vector<8x128xf32>
      tpu.vector_store %arg3[%c0_8, %c0_9], %13 {strides = array<i32>} : memref<8x128xf32, #tpu.memory_space<vmem>>, vector<8x128xf32>,
    } else {
    }
    %c0 = arith.constant 0 : index
    %c0_1 = arith.constant 0 : index
    %3 = vector.load %arg2[%c0, %c0_1] : memref<16x128xf32, #tpu.memory_space<vmem>>, vector<16x128xf32>
    %c0_2 = arith.constant 0 : index
    %c0_3 = arith.constant 0 : index
    %4 = vector.load %arg1[%c0_2, %c0_3] : memref<16x128xf32, #tpu.memory_space<vmem>>, vector<16x128xf32>
    %5 = arith.subf %3, %4 : vector<16x128xf32>
    %6 = arith.mulf %5, %5 : vector<16x128xf32>
    %c0_i32_4 = arith.constant 0 : i32
    %7 = arith.cmpi ne, %arg0, %c0_i32_4 : i32
    %8 = arith.extui %7 : i1 to i32
    %c0_i32_5 = arith.constant 0 : i32
    %9 = arith.cmpi ne, %8, %c0_i32_5 : i32
    scf.if %9 {
      %c0_8 = arith.constant 0 : index
      %c0_9 = arith.constant 0 : index
      %13 = vector.load %arg3[%c0_8, %c0_9] : memref<8x128xf32, #tpu.memory_space<vmem>>, vector<8x128xf32>
      %14 = vector.shape_cast %6 : vector<16x128xf32> to vector<2x8x128xf32>
      %cst = arith.constant dense<0.000000e+00> : vector<8x128xf32>
      %15 = vector.multi_reduction <add>, %14, %cst [0] : vector<2x8x128xf32> to vector<8x128xf32>
      %16 = arith.addf %13, %15 : vector<8x128xf32>
      %c0_10 = arith.constant 0 : index
      %c0_11 = arith.constant 0 : index
      %17 = vector.load %arg3[%c0_10, %c0_11] : memref<8x128xf32, #tpu.memory_space<vmem>>, vector<8x128xf32>
      tpu.vector_store %arg3[%c0_10, %c0_11], %16 {strides = array<i32>} : memref<8x128xf32, #tpu.memory_space<vmem>>, vector<8x128xf32>,
    } else {
    }
    %c0_i32_6 = arith.constant 0 : i32
    %10 = arith.cmpi eq, %arg0, %c0_i32_6 : i32
    %11 = arith.extui %10 : i1 to i32
    %c0_i32_7 = arith.constant 0 : i32
    %12 = arith.cmpi ne, %11, %c0_i32_7 : i32
    scf.if %12 {
      %13 = tpu.iota {dimensions = array<i32: 0>} : vector<16x128xi32>
      %c16_i32 = arith.constant 16 : i32
      %14 = arith.muli %arg0, %c16_i32 : i32
      %15 = vector.broadcast %14 : i32 to vector<16x128xi32>
      %16 = arith.addi %13, %15 : vector<16x128xi32>
      %c16_i32_8 = arith.constant 16 : i32
      %17 = vector.broadcast %c16_i32_8 : i32 to vector<16x128xi32>
      %18 = arith.cmpi slt, %16, %17 : vector<16x128xi32>
      %cst = arith.constant 0.000000e+00 : f32
      %19 = vector.broadcast %cst : f32 to vector<16x128xf32>
      %20 = arith.select %18, %6, %19 : vector<16x128xi1>, vector<16x128xf32>
      %c0_9 = arith.constant 0 : index
      %c0_10 = arith.constant 0 : index
      %21 = vector.load %arg3[%c0_9, %c0_10] : memref<8x128xf32, #tpu.memory_space<vmem>>, vector<8x128xf32>
      %22 = vector.shape_cast %20 : vector<16x128xf32> to vector<2x8x128xf32>
      %cst_11 = arith.constant dense<0.000000e+00> : vector<8x128xf32>
      %23 = vector.multi_reduction <add>, %22, %cst_11 [0] : vector<2x8x128xf32> to vector<8x128xf32>
      %24 = arith.addf %21, %23 : vector<8x128xf32>
      %c0_12 = arith.constant 0 : index
      %c0_13 = arith.constant 0 : index
      %25 = vector.load %arg3[%c0_12, %c0_13] : memref<8x128xf32, #tpu.memory_space<vmem>>, vector<8x128xf32>
      tpu.vector_store %arg3[%c0_12, %c0_13], %24 {strides = array<i32>} : memref<8x128xf32, #tpu.memory_space<vmem>>, vector<8x128xf32>,
    } else {
    }
    return
  }
  func.func @transform_0(%arg0: i32) -> (i32, i32) {
    %c0_i32 = arith.constant 0 : i32
    %c0_i32_0 = arith.constant 0 : i32
    return %arg0, %c0_i32 : i32, i32
  }
  func.func @transform_1(%arg0: i32) -> (i32, i32) {
    %c0_i32 = arith.constant 0 : i32
    %c0_i32_0 = arith.constant 0 : i32
    return %arg0, %c0_i32 : i32, i32
  }
  func.func @transform_2(%arg0: i32) -> (i32, i32) {
    %c0_i32 = arith.constant 0 : i32
    %c0_i32_0 = arith.constant 0 : i32
    %c0_i32_1 = arith.constant 0 : i32
    return %c0_i32, %c0_i32_0 : i32, i32
  }
}

</mosaic_0001>

<bundles_post_ra>
// kernel: tpu_custom_call.1
= control target key start
LH: loop header
LB: loop body
LE: loop exit
PB: predicated region body
PF: predicated region fallthrough
CT: control target
= control target key end

     0   :  { %7 = vsyncpa [#allocation3], 0  ;;  %s229_s0 = inlined_call_operand.hbm [shape: f32[16,128], index: 0, kind: input, shape index: {}]   ;;  %s230_s1 = inlined_call_operand.hbm [shape: f32[16,128], index: 1, kind: input, shape index: {}]   ;;  %s231_s2 = inlined_call_operand.hbm [shape: f32[8,128], index: 2, kind: output, shape index: {}]  }
   0x1   :  { %8 = vsyncpa [#allocation6], 0 }
   0x2   :  { %9 = vsyncpa [#allocation4], 0  ;;  %s173_s9 = smov [#allocation2]   ;;  %s101_s13 = scalar_lea.hbm %s229_s0, 256 }
   0x3   :  { %s15_s10 = sshll.u32 %s173_s9, 4  ;;  %p102_p0 = scmp.ne.s32.totalorder %s229_s0, %s101_s13  ;;  %s16_s10 = int_to_ptr.vmem [resolvable:$true] %s15_s10 }
   0x4   :  { %p105_p1 = scmp.lt.u32.totalorder %s101_s13, %s229_s0 }
   0x6   :  { %p107_p2 = pnand %p105_p1, %p102_p0 }
   0x8   :  { %110 = shalt.err (!%p107_p2)
}
   0x9   :  { %s111_s18 = scalar_lea.vmem %s16_s10, 256  ;;  %p116_p4 = scmp.lt.s32.totalorder %s16_s10, %s16_s10 }
   0xa   :  { %p112_p3 = scmp.ne.s32.totalorder %s16_s10, %s111_s18  ;;  %p117_p5 = scmp.lt.s32.totalorder %s111_s18, %s111_s18 }
   0xc   :  { %p118_p6 = por %p117_p5, %p116_p4 }
   0xe   :  { %p119_p7 = pnand %p118_p6, %p112_p3 }
  0x10   :  { %122 = shalt.err (!%p119_p7)
}
  0x11   :  { %s174_s19 = smov 128   ;;  %s175_s20 = smov 8  }
  0x12   :  { %21 = dma.hbm_to_vmem [thread:$0]  %s229_s0, 256, %s16_s10, [#allocation3], %s174_s19, %s174_s19, %s175_s20  }
  0x13   :  { %s176_s23 = smov [#allocation5]   ;;  %s123_s27 = scalar_lea.hbm %s230_s1, 256 }
  0x14   :  { %s27_s24 = sshll.u32 %s176_s23, 4  ;;  %p124_p8 = scmp.ne.s32.totalorder %s230_s1, %s123_s27  ;;  %s28_s24 = int_to_ptr.vmem [resolvable:$true] %s27_s24 }
  0x15   :  { %p127_p9 = scmp.lt.u32.totalorder %s123_s27, %s230_s1 }
  0x17   :  { %p129_p10 = pnand %p127_p9, %p124_p8 }
  0x19   :  { %132 = shalt.err (!%p129_p10)
}
  0x1a   :  { %s133_s4 = scalar_lea.vmem %s28_s24, 256  ;;  %p138_p12 = scmp.lt.s32.totalorder %s28_s24, %s28_s24 }
  0x1b   :  { %p134_p11 = scmp.ne.s32.totalorder %s28_s24, %s133_s4  ;;  %p139_p13 = scmp.lt.s32.totalorder %s133_s4, %s133_s4 }
  0x1d   :  { %p140_p0 = por %p139_p13, %p138_p12 }
  0x1f   :  { %p141_p1 = pnand %p140_p0, %p134_p11 }
  0x21   :  { %144 = shalt.err (!%p141_p1)
}
  0x22   :  { %33 = dma.hbm_to_vmem [thread:$0]  %s230_s1, 256, %s28_s24, [#allocation6], %s174_s19, %s174_s19, %s175_s20  }
  0x23   :  { %167 = dma.done.wait [#allocation3], 256  }
  0x24   :  { %168 = vsyncadd [#allocation3], 4294967040 }
  0x25   :  { %169 = dma.done.wait [#allocation6], 256  }
  0x26   :  { %170 = vsyncadd [#allocation6], 4294967040  ;;  %v45_v0 = vld [vmem:[#allocation5] sm:$0xff]  ;;  %v46_v1 = vld [vmem:[#allocation5 + $0x8] sm:$0xff]  ;;  %s177_s6 = smov [#allocation7]  }
  0x27   :  { %v47_v2 = vld [vmem:[#allocation2] sm:$0xff]  ;;  %v48_v3 = vld [vmem:[#allocation2 + $0x8] sm:$0xff]  ;;  %s85_s7 = sshll.u32 %s177_s6, 4  ;;  %s86_s7 = int_to_ptr.vmem [resolvable:$true] %s85_s7 }
  0x28   :  { %v49_v4 = vsub.f32 %v45_v0, %v47_v2  ;;  %v50_v5 = vsub.f32 %v46_v1, %v48_v3  ;;  %s145_s8 = scalar_lea.vmem %s86_s7, 128  ;;  %p150_p3 = scmp.lt.s32.totalorder %s86_s7, %s86_s7 }
  0x29   :  { %p146_p2 = scmp.ne.s32.totalorder %s86_s7, %s145_s8  ;;  %p151_p4 = scmp.lt.s32.totalorder %s145_s8, %s145_s8 }
  0x2a   :  { %v51_v6 = vmul.f32 %v49_v4, %v49_v4  ;;  %v52_v7 = vmul.f32 %v50_v5, %v50_v5 }
  0x2b   :  { %p152_p5 = por %p151_p4, %p150_p3 }
  0x2c   :  { %v76_v8 = vadd.f32 %v52_v7, %v51_v6 }
  0x2d   :  { %p153_p6 = pnand %p152_p5, %p146_p2 }
  0x2e   :  { %78 = vst [vmem:[#allocation7] sm:$0xff] %v76_v8 }
  0x2f   :  { %156 = shalt.err (!%p153_p6)
}
  0x30   :  { %s157_s10 = scalar_lea.hbm %s231_s2, 128 }
  0x31   :  { %p158_p7 = scmp.ne.s32.totalorder %s231_s2, %s157_s10  ;;  %p161_p8 = scmp.lt.u32.totalorder %s157_s10, %s231_s2 }
  0x33   :  { %p163_p9 = pnand %p161_p8, %p158_p7 }
  0x35   :  { %166 = shalt.err (!%p163_p9)
}
  0x36   :  { %88 = dma.vmem_to_hbm [thread:$0]  %s86_s7, 128, %s231_s2, [#allocation4]  }
  0x37   :  { %171 = dma.done.wait [#allocation4], 128  }
  0x38   :  { %172 = vsyncadd [#allocation4], 4294967168 }
  0x39   :  { %92 = vsyncpa [#allocation3], 1 }
  0x3a   :  { %93 = vsyncpa [#allocation6], 1 }
  0x3b   :  { %94 = vsyncpa [#allocation4], 1 }

</bundles_post_ra>
